<compile_context>
chip_gen: v6e
topology: v6e:2x2x1
jax: 0.10.0
libtpu: 0.0.40
codegen_flags: <defaults>
</compile_context>

<pallas_src>
import jax
import jax.numpy as jnp
from jax.experimental import pallas as pl
from jax.experimental.pallas import tpu as pltpu

LANE = 128
SUBLANE = 8


def _round_up(x, m):
    return (x + m - 1) // m * m


def mlp_kernel(x_ref, w1_ref, b1_ref, w2_ref, b2_ref, out_ref, feat_ref):
    # x_ref:  (TM, 784) bf16     w1_ref: (784, Hp) bf16   b1_ref: (1, Hp) f32
    # w2_ref: (Hp, Np) bf16      b2_ref: (1, Np) f32
    # out_ref: (TM, Np) f32      feat_ref: (TM, Hp) bf16
    h = jnp.dot(x_ref[...], w1_ref[...],
                preferred_element_type=jnp.float32) + b1_ref[...]
    feat = jnp.maximum(h, 0.0)                      # ReLU in f32 (VPU)
    feat_bf = feat.astype(jnp.bfloat16)
    feat_ref[...] = feat_bf                         # lane-dense (TM, 128) bf16 store
    out = jnp.dot(feat_bf, w2_ref[...],
                  preferred_element_type=jnp.float32) + b2_ref[...]
    out_ref[...] = out.astype(out_ref.dtype)        # lane-dense (TM, 128) f32 store


def mlp_forward(x, w1, b1, w2, b2, *, block_m=1024):
    """x: (B, 1, 28, 28) float32.  Returns (logits (B,10), features (B,H))."""
    B = x.shape[0]
    x_flat = x.reshape(B, -1)                       # flatten (glue)
    K = x_flat.shape[1]                             # 784 (no lane padding)
    H = w1.shape[1]                                 # hidden
    N = w2.shape[1]                                 # 10

    Hp = _round_up(H, LANE)                         # 128
    Np = _round_up(N, LANE)                         # 128

    # Batch tile: large enough to amortize per-step overhead (mem-bound), but
    # capped near ceil(B/2) so the grid has >= 2 steps when B allows it
    # (keeps both v7x TensorCores busy). Always a multiple of the sublane pack.
    half = _round_up(max(pl.cdiv(B, 2), SUBLANE), SUBLANE)
    TM = min(_round_up(block_m, SUBLANE), half)
    Bp = _round_up(B, TM)

    # Single-pass pad on the batch dim only, fused with the bf16 cast.
    x_bf = x_flat.astype(jnp.bfloat16)
    if Bp != B:
        x_bf = jnp.pad(x_bf, ((0, Bp - B), (0, 0)))

    # Weights / biases: zero-pad the narrow dims so padded lanes stay exactly 0.
    w1_p = jnp.pad(w1.astype(jnp.bfloat16), ((0, 0), (0, Hp - H)))
    w2_p = jnp.pad(w2.astype(jnp.bfloat16), ((0, Hp - H), (0, Np - N)))
    b1_p = jnp.pad(b1.reshape(1, H).astype(jnp.float32), ((0, 0), (0, Hp - H)))
    b2_p = jnp.pad(b2.reshape(1, N).astype(jnp.float32), ((0, 0), (0, Np - N)))

    grid = (Bp // TM,)

    flops = 2 * Bp * (K * Hp + Hp * Np)
    bytes_accessed = (Bp * K * 2                    # x read (bf16)
                      + K * Hp * 2 + Hp * Np * 2    # weights (bf16)
                      + (Hp + Np) * 4               # biases (f32)
                      + Bp * Np * 4                 # logits writeback (f32)
                      + Bp * Hp * 2)                # feat writeback (bf16)
    cost = pl.CostEstimate(flops=flops, transcendentals=0,
                           bytes_accessed=bytes_accessed)

    out_p, feat_p = pl.pallas_call(
        mlp_kernel,
        out_shape=(
            jax.ShapeDtypeStruct((Bp, Np), jnp.float32),
            jax.ShapeDtypeStruct((Bp, Hp), jnp.bfloat16),
        ),
        grid=grid,
        in_specs=[
            pl.BlockSpec((TM, K), lambda i: (i, 0)),    # x tile (pipelined)
            pl.BlockSpec((K, Hp), lambda i: (0, 0)),    # w1 resident
            pl.BlockSpec((1, Hp), lambda i: (0, 0)),    # b1 resident
            pl.BlockSpec((Hp, Np), lambda i: (0, 0)),   # w2 resident
            pl.BlockSpec((1, Np), lambda i: (0, 0)),    # b2 resident
        ],
        out_specs=(
            pl.BlockSpec((TM, Np), lambda i: (i, 0)),   # logits tile
            pl.BlockSpec((TM, Hp), lambda i: (i, 0)),   # feature tile
        ),
        compiler_params=pltpu.CompilerParams(
            dimension_semantics=("parallel",),          # shard over TCs on v7x
        ),
        cost_estimate=cost,
    )(x_bf, w1_p, b1_p, w2_p, b2_p)

    # Slice padding back off; module semantics: (B, 10) f32, (B, H) f32.
    return out_p[:B, :N], feat_p[:B, :H].astype(jnp.float32)


def init_params(key, in_dim=784, hidden_dim=32, out_dim=10):
    # Deterministic init mimicking PyTorch Linear default (uniform +-1/sqrt(fan_in)).
    k1, k2, k3, k4 = jax.random.split(key, 4)
    lim1 = 1.0 / jnp.sqrt(jnp.float32(in_dim))
    lim2 = 1.0 / jnp.sqrt(jnp.float32(hidden_dim))
    w1 = jax.random.uniform(k1, (in_dim, hidden_dim), jnp.float32, -lim1, lim1)
    b1 = jax.random.uniform(k2, (1, hidden_dim), jnp.float32, -lim1, lim1)
    w2 = jax.random.uniform(k3, (hidden_dim, out_dim), jnp.float32, -lim2, lim2)
    b2 = jax.random.uniform(k4, (1, out_dim), jnp.float32, -lim2, lim2)
    return w1, b1, w2, b2


def _reference(x, w1, b1, w2, b2):
    x_flat = x.reshape(x.shape[0], -1)
    feat = jnp.maximum(x_flat @ w1 + b1, 0.0)
    return feat @ w2 + b2, feat


if __name__ == "__main__":
    key = jax.random.PRNGKey(0)
    kx, kp, kx2 = jax.random.split(key, 3)

    hidden_dim = 32
    w1, b1, w2, b2 = init_params(kp, hidden_dim=hidden_dim)
    fwd = jax.jit(mlp_forward)

    # Small shape consistent with the module spec (B=2, 1x28x28 images).
    B = 2
    x = jax.random.normal(kx, (B, 1, 28, 28), jnp.float32)
    out, feat = fwd(x, w1, b1, w2, b2)
    jax.block_until_ready((out, feat))

    out_ref, feat_ref = _reference(x, w1, b1, w2, b2)
    assert out.shape == (B, 10) and feat.shape == (B, hidden_dim)
    # bf16 inputs/feat with f32 accumulation -> small quantization error vs f32 ref.
    assert jnp.allclose(out, out_ref, atol=3e-2), "output mismatch"
    assert jnp.allclose(feat, feat_ref, atol=3e-2), "feature mismatch"

    # Also exercise the multi-tile grid path (grid length >= 2).
    B2 = 300
    x2 = jax.random.normal(kx2, (B2, 1, 28, 28), jnp.float32)
    out2, feat2 = fwd(x2, w1, b1, w2, b2)
    jax.block_until_ready((out2, feat2))
    out2_ref, feat2_ref = _reference(x2, w1, b1, w2, b2)
    assert out2.shape == (B2, 10) and feat2.shape == (B2, hidden_dim)
    assert jnp.allclose(out2, out2_ref, atol=3e-2), "output mismatch (B=300)"
    assert jnp.allclose(feat2, feat2_ref, atol=3e-2), "feature mismatch (B=300)"

    print("KERNEL_OK")
</pallas_src>

<mosaic_0001>
module attributes {stable_mosaic.version = 11 : i64} {
  func.func @mlp_kernel(%arg0: i32, %arg1: memref<8x784xbf16, #tpu.memory_space<vmem>>, %arg2: memref<784x128xbf16, #tpu.memory_space<vmem>>, %arg3: memref<1x128xf32, #tpu.memory_space<vmem>>, %arg4: memref<128x128xbf16, #tpu.memory_space<vmem>>, %arg5: memref<1x128xf32, #tpu.memory_space<vmem>>, %arg6: memref<8x128xf32, #tpu.memory_space<vmem>>, %arg7: memref<8x128xbf16, #tpu.memory_space<vmem>>) attributes {dimension_semantics = [#tpu.dimension_semantics<parallel>], iteration_bounds = array<i64: 1>, scalar_prefetch = 0 : i64, scratch_operands = 0 : i64, tpu.core_type = #tpu.core_type<tc>, window_params = [{transform_indices = @transform_0, window_bounds = array<i64: 8, 784>}, {pipeline_mode = #tpu.pipeline_mode<synchronous>, transform_indices = @transform_1, window_bounds = array<i64: 784, 128>}, {pipeline_mode = #tpu.pipeline_mode<synchronous>, transform_indices = @transform_2, window_bounds = array<i64: 1, 128>}, {pipeline_mode = #tpu.pipeline_mode<synchronous>, transform_indices = @transform_3, window_bounds = array<i64: 128, 128>}, {pipeline_mode = #tpu.pipeline_mode<synchronous>, transform_indices = @transform_4, window_bounds = array<i64: 1, 128>}, {transform_indices = @transform_5, window_bounds = array<i64: 8, 128>}, {transform_indices = @transform_6, window_bounds = array<i64: 8, 128>}]} {
    %c0 = arith.constant 0 : index
    %c0_0 = arith.constant 0 : index
    %0 = vector.load %arg1[%c0, %c0_0] : memref<8x784xbf16, #tpu.memory_space<vmem>>, vector<8x784xbf16>
    %c0_1 = arith.constant 0 : index
    %c0_2 = arith.constant 0 : index
    %1 = vector.load %arg2[%c0_1, %c0_2] : memref<784x128xbf16, #tpu.memory_space<vmem>>, vector<784x128xbf16>
    %cst = arith.constant dense<0.000000e+00> : vector<8x128xf32>
    %2 = tpu.matmul %0, %1, %cst {dimension_numbers = #tpu.dot_dimension_numbers<[1], [0], [0], [1], [0, 0, 1, 1], [], []>} : vector<8x784xbf16>, vector<784x128xbf16>, vector<8x128xf32> -> vector<8x128xf32>
    %c0_3 = arith.constant 0 : index
    %c0_4 = arith.constant 0 : index
    %3 = vector.load %arg3[%c0_3, %c0_4] : memref<1x128xf32, #tpu.memory_space<vmem>>, vector<1x128xf32>
    %4 = vector.broadcast %3 : vector<1x128xf32> to vector<8x128xf32>
    %5 = arith.addf %2, %4 : vector<8x128xf32>
    %cst_5 = arith.constant 0.000000e+00 : f32
    %6 = vector.broadcast %cst_5 : f32 to vector<8x128xf32>
    %7 = arith.maximumf %5, %6 : vector<8x128xf32>
    %8 = arith.truncf %7 : vector<8x128xf32> to vector<8x128xbf16>
    %c0_6 = arith.constant 0 : index
    %c0_7 = arith.constant 0 : index
    %9 = vector.load %arg7[%c0_6, %c0_7] : memref<8x128xbf16, #tpu.memory_space<vmem>>, vector<8x128xbf16>
    tpu.vector_store %arg7[%c0_6, %c0_7], %8 {strides = array<i32>} : memref<8x128xbf16, #tpu.memory_space<vmem>>, vector<8x128xbf16>,
    %c0_8 = arith.constant 0 : index
    %c0_9 = arith.constant 0 : index
    %10 = vector.load %arg4[%c0_8, %c0_9] : memref<128x128xbf16, #tpu.memory_space<vmem>>, vector<128x128xbf16>
    %cst_10 = arith.constant dense<0.000000e+00> : vector<8x128xf32>
    %11 = tpu.matmul %8, %10, %cst_10 {dimension_numbers = #tpu.dot_dimension_numbers<[1], [0], [0], [1], [0, 0, 1, 1], [], []>} : vector<8x128xbf16>, vector<128x128xbf16>, vector<8x128xf32> -> vector<8x128xf32>
    %c0_11 = arith.constant 0 : index
    %c0_12 = arith.constant 0 : index
    %12 = vector.load %arg5[%c0_11, %c0_12] : memref<1x128xf32, #tpu.memory_space<vmem>>, vector<1x128xf32>
    %13 = vector.broadcast %12 : vector<1x128xf32> to vector<8x128xf32>
    %14 = arith.addf %11, %13 : vector<8x128xf32>
    %c0_13 = arith.constant 0 : index
    %c0_14 = arith.constant 0 : index
    %15 = vector.load %arg6[%c0_13, %c0_14] : memref<8x128xf32, #tpu.memory_space<vmem>>, vector<8x128xf32>
    tpu.vector_store %arg6[%c0_13, %c0_14], %14 {strides = array<i32>} : memref<8x128xf32, #tpu.memory_space<vmem>>, vector<8x128xf32>,
    return
  }
  func.func @transform_0(%arg0: i32) -> (i32, i32) {
    %c0_i32 = arith.constant 0 : i32
    %c0_i32_0 = arith.constant 0 : i32
    return %arg0, %c0_i32 : i32, i32
  }
  func.func @transform_1(%arg0: i32) -> (i32, i32) {
    %c0_i32 = arith.constant 0 : i32
    %c0_i32_0 = arith.constant 0 : i32
    %c0_i32_1 = arith.constant 0 : i32
    return %c0_i32, %c0_i32_0 : i32, i32
  }
  func.func @transform_2(%arg0: i32) -> (i32, i32) {
    %c0_i32 = arith.constant 0 : i32
    %c0_i32_0 = arith.constant 0 : i32
    %c0_i32_1 = arith.constant 0 : i32
    return %c0_i32, %c0_i32_0 : i32, i32
  }
  func.func @transform_3(%arg0: i32) -> (i32, i32) {
    %c0_i32 = arith.constant 0 : i32
    %c0_i32_0 = arith.constant 0 : i32
    %c0_i32_1 = arith.constant 0 : i32
    return %c0_i32, %c0_i32_0 : i32, i32
  }
  func.func @transform_4(%arg0: i32) -> (i32, i32) {
    %c0_i32 = arith.constant 0 : i32
    %c0_i32_0 = arith.constant 0 : i32
    %c0_i32_1 = arith.constant 0 : i32
    return %c0_i32, %c0_i32_0 : i32, i32
  }
  func.func @transform_5(%arg0: i32) -> (i32, i32) {
    %c0_i32 = arith.constant 0 : i32
    %c0_i32_0 = arith.constant 0 : i32
    return %arg0, %c0_i32 : i32, i32
  }
  func.func @transform_6(%arg0: i32) -> (i32, i32) {
    %c0_i32 = arith.constant 0 : i32
    %c0_i32_0 = arith.constant 0 : i32
    return %arg0, %c0_i32 : i32, i32
  }
}

</mosaic_0001>

<bundles_post_ra>
// kernel: mlp_forward.1
= control target key start
LH: loop header
LB: loop body
LE: loop exit
PB: predicated region body
PF: predicated region fallthrough
CT: control target
= control target key end

     0   :  { %v973_v41 = vmov 0.0   ;;  %vm974_vm0 = vmmov 0   ;;  %vm450_vm1 = vcmask 130048   ;;  %s1218_s1 = inlined_call_operand.vmem [shape: bf16[784,128], index: 1, kind: input, shape index: {}]   ;;  %s1219_s0 = inlined_call_operand.vmem [shape: bf16[8,784], index: 0, kind: input, shape index: {}]   ;;  %s1220_s3 = inlined_call_operand.vmem [shape: bf16[128,128], index: 3, kind: input, shape index: {}]   ;;  %s1221_s2 = inlined_call_operand.vmem [shape: f32[1,128], index: 2, kind: input, shape index: {}]   ;;  %s1222_s6 = inlined_call_operand.vmem [shape: bf16[8,128], index: 6, kind: output, shape index: {1}]   ;;  %s1223_s4 = inlined_call_operand.vmem [shape: f32[1,128], index: 4, kind: input, shape index: {}]   ;;  %s1224_s5 = inlined_call_operand.vmem [shape: f32[8,128], index: 5, kind: output, shape index: {0}]  }
   0x1   :  { %v909_v0 = vld [vmem:[%s1218_s1 + $0x78] sm:$0xff]   ;;  %v913_v4 = vld [vmem:[%s1218_s1 + $0x70] sm:$0xff]   ;;  %v917_v8 = vld [vmem:[%s1218_s1 + $0x68] sm:$0xff]  }
   0x2   :  { %v910_v1 = vld [vmem:[%s1218_s1 + $0x38] sm:$0xff]   ;;  %804 = vmatprep.subr.bf16.mxu0 %v909_v0  ;;  %v914_v5 = vld [vmem:[%s1218_s1 + $0x30] sm:$0xff]   ;;  %v918_v9 = vld [vmem:[%s1218_s1 + $0x28] sm:$0xff]  }
   0x3   :  { %v911_v2 = vld [vmem:[%s1218_s1 + $0xf8] sm:$0xff]   ;;  %805 = vmatpush3.bf16.msra.mxu0 %v910_v1  ;;  %v915_v6 = vld [vmem:[%s1218_s1 + $0xf0] sm:$0xff]   ;;  %v919_v10 = vld [vmem:[%s1218_s1 + $0xe8] sm:$0xff]  }
   0x4   :  { %v912_v3 = vld [vmem:[%s1218_s1 + $0xb8] sm:$0xff]   ;;  %826 = vmatprep.subr.bf16.mxu1 %v911_v2  ;;  %806 = vmatprep.subr.bf16.mxu0 %v913_v4  ;;  %v916_v7 = vld [vmem:[%s1218_s1 + $0xb0] sm:$0xff]   ;;  %v920_v11 = vld [vmem:[%s1218_s1 + $0xa8] sm:$0xff]  }
   0x5   :  { %827 = vmatpush3.bf16.msra.mxu1 %v912_v3  ;;  %v921_v12 = vld [vmem:[%s1218_s1 + $0x60] sm:$0xff]   ;;  %v925_v16 = vld [vmem:[%s1218_s1 + $0x58] sm:$0xff]   ;;  %v929_v20 = vld [vmem:[%s1218_s1 + $0x50] sm:$0xff]  }
   0x6   :  { %828 = vmatprep.subr.bf16.mxu1 %v915_v6  ;;  %v922_v13 = vld [vmem:[%s1218_s1 + $0x20] sm:$0xff]   ;;  %v926_v17 = vld [vmem:[%s1218_s1 + $0x18] sm:$0xff]   ;;  %v930_v21 = vld [vmem:[%s1218_s1 + $0x10] sm:$0xff]  }
   0x7   :  { %807 = vmatpush3.bf16.msra.mxu0 %v914_v5  ;;  %v923_v14 = vld [vmem:[%s1218_s1 + $0xe0] sm:$0xff]   ;;  %v927_v18 = vld [vmem:[%s1218_s1 + $0xd8] sm:$0xff]   ;;  %v931_v22 = vld [vmem:[%s1218_s1 + $0xd0] sm:$0xff]  }
   0x8   :  { %808 = vmatprep.subr.bf16.mxu0 %v917_v8  ;;  %v924_v15 = vld [vmem:[%s1218_s1 + $0xa0] sm:$0xff]   ;;  %v928_v19 = vld [vmem:[%s1218_s1 + $0x98] sm:$0xff]   ;;  %v932_v23 = vld [vmem:[%s1218_s1 + $0x90] sm:$0xff]  }
   0x9   :  { %829 = vmatpush3.bf16.msra.mxu1 %v916_v7  ;;  %v933_v24 = vld [vmem:[%s1218_s1 + $0x48] sm:$0xff]   ;;  %v937_v28 = vld [vmem:[%s1218_s1 + $0x40] sm:$0xff]   ;;  %v944_v35 = vld [vmem:[%s1218_s1 + $0x178] sm:$0xff]  }
   0xa   :  { %830 = vmatprep.subr.bf16.mxu1 %v919_v10  ;;  %v934_v25 = vld [vmem:[%s1218_s1 + $0x8] sm:$0xff]   ;;  %v938_v29 = vld [vmem:[%s1218_s1] sm:$0xff]   ;;  %v947_v39 = vld [vmem:[%s1218_s1 + $0x138] sm:$0xff]  }
   0xb   :  { %809 = vmatpush3.bf16.msra.mxu0 %v918_v9  ;;  %v935_v26 = vld [vmem:[%s1218_s1 + $0xc8] sm:$0xff]   ;;  %v939_v30 = vld [vmem:[%s1218_s1 + $0xc0] sm:$0xff]   ;;  %v948_v40 = vld [vmem:[%s1218_s1 + $0x170] sm:$0xff]  }
   0xc   :  { %810 = vmatprep.subr.bf16.mxu0 %v921_v12  ;;  %v936_v27 = vld [vmem:[%s1218_s1 + $0x88] sm:$0xff]   ;;  %v23_v31 = vld [vmem:[%s1219_s0] sm:$0xff]  ;;  %v949_v42 = vld [vmem:[%s1218_s1 + $0x130] sm:$0xff]  }
   0xd   :  { %831 = vmatpush3.bf16.msra.mxu1 %v920_v11  ;;  %v738_v32 = vcombine.low %v23_v31, %v23_v31  ;;  %v739_v33 = vcombine.high %v23_v31, %v23_v31  ;;  %v943_v34 = vld [vmem:[%s1218_s1 + $0x80] sm:$0xff]   ;;  %v24_v36 = vld [vmem:[%s1219_s0 + $0x8] sm:$0xff]  ;;  %v954_v47 = vld [vmem:[%s1218_s1 + $0x158] sm:$0xff]  }
   0xe   :  { %832 = vmatprep.subr.bf16.mxu1 %v923_v14  ;;  %v740_v37 = vcombine.low %v24_v36, %v24_v36  ;;  %v741_v38 = vcombine.high %v24_v36, %v24_v36  ;;  %v950_v43 = vld [vmem:[%s1218_s1 + $0x168] sm:$0xff]   ;;  %v952_v45 = vld [vmem:[%s1218_s1 + $0x160] sm:$0xff]   ;;  %v955_v48 = vld [vmem:[%s1218_s1 + $0x118] sm:$0xff]  }
   0xf   :  { %811 = vmatpush3.bf16.msra.mxu0 %v922_v13  ;;  %486 = vmatprep.mubr.bf16.mxu0 %v739_v33  ;;  %v951_v44 = vld [vmem:[%s1218_s1 + $0x128] sm:$0xff]   ;;  %v953_v46 = vld [vmem:[%s1218_s1 + $0x120] sm:$0xff]   ;;  %v956_v49 = vld [vmem:[%s1218_s1 + $0x150] sm:$0xff]  }
  0x10   :  { %812 = vmatprep.subr.bf16.mxu0 %v925_v16  ;;  %526 = vmatprep.mubr.bf16.mxu1 %v741_v38  ;;  %v962_v50 = vld [vmem:[%s1218_s1 + $0x180] sm:$0xff]   ;;  %v25_v51 = vld [vmem:[%s1219_s0 + $0x10] sm:$0xff]  ;;  %v942_v52 = vld [vmem:[%s1219_s0 + $0x18] ss:$0 sps:$4 sm:$0xff]  }
  0x11   :  { %833 = vmatpush3.bf16.msra.mxu1 %v924_v15  ;;  %v743_v53 = vcombine.high %v25_v51, %v25_v51  ;;  %v957_v54 = vld [vmem:[%s1218_s1 + $0x110] sm:$0xff]   ;;  %v958_v55 = vld [vmem:[%s1218_s1 + $0x148] sm:$0xff]   ;;  %v960_v57 = vld [vmem:[%s1218_s1 + $0x140] sm:$0xff]   ;;  %v742_v59 = vcombine.low %v25_v51, %v25_v51 }
  0x12   :  { %834 = vmatprep.subr.bf16.mxu1 %v927_v18  ;;  %v959_v56 = vld [vmem:[%s1218_s1 + $0x108] sm:$0xff]   ;;  %v961_v58 = vld [vmem:[%s1218_s1 + $0x100] sm:$0xff]   ;;  %v965_v60 = vld [vmem:[%s1220_s3 + $0x38] sm:$0xff]  }
  0x13   :  { %813 = vmatpush3.bf16.msra.mxu0 %v926_v17  ;;  %v966_v61 = vld [vmem:[%s1220_s3 + $0x30] sm:$0xff]   ;;  %v967_v62 = vld [vmem:[%s1220_s3 + $0x28] sm:$0xff]   ;;  %v968_v63 = vld [vmem:[%s1220_s3 + $0x20] sm:$0xff]  }
  0x14   :  { %814 = vmatprep.subr.bf16.mxu0 %v929_v20  ;;  %v969_v0 = vld [vmem:[%s1220_s3 + $0x18] sm:$0xff]   ;;  %v970_v1 = vld [vmem:[%s1220_s3 + $0x10] sm:$0xff]   ;;  %v971_v2 = vld [vmem:[%s1220_s3 + $0x8] sm:$0xff]  }
  0x15   :  { %835 = vmatpush3.bf16.msra.mxu1 %v928_v19  ;;  %v972_v3 = vld [vmem:[%s1220_s3] sm:$0xff]  }
  0x16   :  { %836 = vmatprep.subr.bf16.mxu1 %v931_v22  ;;  %v737_v17 = vld [vmem:[%s1221_s2] ss:$0 sm:$0xff] }
  0x17   :  { %815 = vmatpush3.bf16.msra.mxu0 %v930_v21 }
  0x18   :  { %816 = vmatprep.subr.bf16.mxu0 %v933_v24 }
  0x19   :  { %837 = vmatpush3.bf16.msra.mxu1 %v932_v23 }
  0x1a   :  { %838 = vmatprep.subr.bf16.mxu1 %v935_v26 }
  0x1b   :  { %817 = vmatpush3.bf16.msra.mxu0 %v934_v25 }
  0x1c   :  { %818 = vmatprep.subr.bf16.mxu0 %v937_v28 }
  0x1d   :  { %839 = vmatpush3.bf16.msra.mxu1 %v936_v27 }
  0x1e   :  { %840 = vmatprep.subr.bf16.mxu1 %v939_v30  ;;  %v795_v30 = vld [vmem:[%s1223_s4] ss:$0 sm:$0xff] }
  0x1f   :  { %819 = vmatpush3.bf16.msra.mxu0 %v938_v29 }
  0x20   :  { %848 = vmatprep.subr.bf16.mxu0 %v944_v35 }
  0x21   :  { %841 = vmatpush3.bf16.msra.mxu1 %v943_v34 }
  0x22   :  { %487 = vmatmul.mubr.bf16.vlgmr.msra.gmra.mxu0 %v738_v32  ;;  %881 = vmatprep.subr.bf16.mxu1 %v973_v41 }
  0x23   :  { %849 = vmatpush3.bf16.msra.mxu0 %v947_v39  ;;  %566 = vmatprep.mubr.bf16.mxu0 %v743_v53 }
  0x24   :  { %527 = vmatmul.mubr.bf16.vlgmr.msra.gmra.mxu1 %v740_v37  ;;  %850 = vmatprep.subr.bf16.mxu0 %v948_v40 }
  0x25   :  { %883 = vmatprep.mubr.msk.bf16.mxu1 %vm974_vm0, %v973_v41  ;;  %882 = vmatpush3.bf16.msra.mxu1 %v962_v50 }
  0x26   :  { %887 = vmatprep.subr.bf16.mxu1 %v973_v41 }
  0x27   :  { %851 = vmatpush3.bf16.msra.mxu0 %v949_v42 }
  0x28   :  { %852 = vmatprep.subr.bf16.mxu0 %v950_v43 }
  0x2b   :  { %853 = vmatpush3.bf16.msra.mxu0 %v951_v44 }
  0x2c   :  { %854 = vmatprep.subr.bf16.mxu0 %v952_v45  ;;  %884 = vmatmul.mubr.msk.bf16.vlgmr.msra.gmra.mxu1 %vm450_vm1, %v942_v52 }
  0x2d   :  { %903 = vmatprep.mubr.msk.bf16.mxu1 %vm974_vm0, %v973_v41  ;;  %888 = vmatpush3.bf16.msra.mxu1 %v965_v60 }
  0x2e   :  { %889 = vmatprep.subr.bf16.mxu1 %v973_v41 }
  0x2f   :  { %855 = vmatpush3.bf16.msra.mxu0 %v953_v46 }
  0x30   :  { %856 = vmatprep.subr.bf16.mxu0 %v954_v47 }
  0x31   :  { %890 = vmatpush3.bf16.msra.mxu1 %v966_v61 }
  0x32   :  { %891 = vmatprep.subr.bf16.mxu1 %v973_v41 }
  0x33   :  { %857 = vmatpush3.bf16.msra.mxu0 %v955_v48 }
  0x34   :  { %858 = vmatprep.subr.bf16.mxu0 %v956_v49 }
  0x35   :  { %892 = vmatpush3.bf16.msra.mxu1 %v967_v62 }
  0x36   :  { %893 = vmatprep.subr.bf16.mxu1 %v973_v41 }
  0x37   :  { %859 = vmatpush3.bf16.msra.mxu0 %v957_v54 }
  0x38   :  { %860 = vmatprep.subr.bf16.mxu0 %v958_v55 }
  0x39   :  { %894 = vmatpush3.bf16.msra.mxu1 %v968_v63 }
  0x3a   :  { %895 = vmatprep.subr.bf16.mxu1 %v973_v41 }
  0x3b   :  { %861 = vmatpush3.bf16.msra.mxu0 %v959_v56 }
  0x3c   :  { %862 = vmatprep.subr.bf16.mxu0 %v960_v57 }
  0x3d   :  { %896 = vmatpush3.bf16.msra.mxu1 %v969_v0 }
  0x3e   :  { %897 = vmatprep.subr.bf16.mxu1 %v973_v41 }
  0x3f   :  { %863 = vmatpush3.bf16.msra.mxu0 %v961_v58 }
  0x41   :  { %898 = vmatpush3.bf16.msra.mxu1 %v970_v1 }
  0x42   :  { %567 = vmatmul.mubr.bf16.vlgmr.msra.gmra.mxu0 %v742_v59  ;;  %899 = vmatprep.subr.bf16.mxu1 %v973_v41 }
  0x45   :  { %900 = vmatpush3.bf16.msra.mxu1 %v971_v2 }
  0x46   :  { %901 = vmatprep.subr.bf16.mxu1 %v973_v41 }
  0x49   :  { %902 = vmatpush3.bf16.msra.mxu1 %v972_v3 }
  0xe2   :  { %v820_v4 = vpop.f32.mrf.mxu0 }
  0xe4   :  { %v821_v5 = vpop.f32.mrf.mxu0  ;;  %v842_v6 = vpop.f32.mrf.mxu1 }
  0xe5   :  { %v822_v16 = vadd.f32 %v821_v5, %v820_v4 }
  0xe6   :  { %v823_v7 = vpop.f32.mrf.mxu0  ;;  %v843_v8 = vpop.f32.mrf.mxu1 }
  0xe7   :  { %v489_v18 = vadd.f32 %v822_v16, %v737_v17  ;;  %v844_v19 = vadd.f32 %v843_v8, %v842_v6 }
  0xe8   :  { %v824_v9 = vpop.f32.mrf.mxu0  ;;  %v845_v10 = vpop.f32.mrf.mxu1 }
  0xe9   :  { %v529_v22 = vadd.f32 %v844_v19, %v489_v18 }
  0xea   :  { %v846_v11 = vpop.f32.mrf.mxu1 }
  0xec   :  { %v608_v12 = vpop.f32.mrf.mxu1 }
  0xee   :  { %v885_v13 = vpop.f32.mrf.mxu1 }
  0xf0   :  { %v611_v14 = vpop.f32.mrf.mxu1 }
  0xf2   :  { %v886_v15 = vpop.f32.mrf.mxu1 }
 0x102   :  { %v864_v20 = vpop.f32.mrf.mxu0 }
 0x104   :  { %v865_v21 = vpop.f32.mrf.mxu0 }
 0x105   :  { %v866_v23 = vadd.f32 %v865_v21, %v864_v20 }
 0x106   :  { %v867_v24 = vpop.f32.mrf.mxu0 }
 0x107   :  { %v569_v25 = vadd.f32 %v866_v23, %v529_v22 }
 0x108   :  { %v868_v26 = vpop.f32.mrf.mxu0 }
 0x109   :  { %v609_v27 = vadd.f32 %v608_v12, %v569_v25 }
 0x10b   :  { %v614_v28 = vmax.f32 %v609_v27, 0.0 }
 0x10d   :  { %v615_v29 = vpack.c.bf16 %v614_v28, %v614_v28 }
 0x10f   :  { %616 = vst [vmem:[%s1222_s6] sm:$0xf] %v615_v29  ;;  %904 = vmatmul.mubr.bf16.vlgmr.msra.gmra.mxu1 %v615_v29 }
 0x1cf   :  { %v722_v31 = vpop.f32.mrf.mxu1 }
 0x1d0   :  { %v723_v32 = vadd.f32 %v795_v30, %v722_v31 }
 0x1d1   :  { %v905_v33 = vpop.f32.mrf.mxu1 }
 0x1d2   :  { %728 = vst [vmem:[%s1224_s5] sm:$0xff] %v723_v32 }
 0x1d3   :  { %v725_v34 = vpop.f32.mrf.mxu1 }
 0x1d5   :  { %v906_v35 = vpop.f32.mrf.mxu1 }

</bundles_post_ra>
